<compile_context>
chip_gen: v6e
topology: v6e:2x2x1
jax: 0.10.0
libtpu: 0.0.40
codegen_flags: <defaults>
</compile_context>

<pallas_src>
import functools

import jax
import jax.numpy as jnp
from jax import lax
from jax.experimental import pallas as pl
from jax.experimental.pallas import tpu as pltpu


def _round_up(n, m):
    return ((n + m - 1) // m) * m


def gatnet_kernel(x_ref, w1_ref, s1_ref, r1_ref, b1_ref, adj1_ref,
                  w2_ref, att2_ref, b2_ref, adj2_ref, out_ref,
                  xps_ref, e1_ref, h1_ref,
                  *, out_channels, neg_slope=0.2):
    i = pl.program_id(0)
    t = adj1_ref.shape[0]                       # dst-tile rows for layer 1

    # ---- phase 0 (first grid step only): source-side projection + factors ----
    @pl.when(i == 0)
    def _():
        xp = jnp.dot(x_ref[...], w1_ref[...],
                     preferred_element_type=jnp.float32)          # [Ns, H*C]
        a = jnp.dot(xp, s1_ref[...],
                    preferred_element_type=jnp.float32)           # [Ns, H]
        a = jnp.where(a > 0, a, neg_slope * a)                    # leaky_relu
        m = jnp.max(a, axis=0, keepdims=True)                     # global per-head max
        e = jnp.exp(a - m)                                        # [Ns, H]
        e1_ref[...] = e
        # broadcast e per head across its C lanes via 0/1 matmul (no lane relayout)
        eb = jnp.dot(e, r1_ref[...], preferred_element_type=jnp.float32)
        xps_ref[...] = xp * eb                                    # exp-scaled features

    # ---- layer-1 aggregation for this destination tile -----------------------
    adj1 = adj1_ref[...].astype(jnp.float32)                      # bf16 -> f32
    num = jnp.dot(adj1, xps_ref[...], preferred_element_type=jnp.float32)  # [T, H*C]
    den = jnp.dot(adj1, e1_ref[...], preferred_element_type=jnp.float32)   # [T, H]
    inv = pl.reciprocal(jnp.maximum(den, 1e-30), approx=True)              # [T, H]
    invb = jnp.dot(inv, r1_ref[...], preferred_element_type=jnp.float32)   # [T, H*C]
    h1 = num * invb + b1_ref[...]
    h1 = jnp.where(h1 > 0, h1, jnp.exp(jnp.minimum(h1, 0.0)) - 1.0)        # ELU (overflow-safe)
    # TODO(synk): F.dropout(p=0.5) is identity in eval mode; training-mode RNG dropout not implemented.
    row0 = pl.multiple_of(i * t, t)
    h1_ref[pl.ds(row0, t), :] = h1

    # ---- layer 2 + log_softmax once all dst-1 tiles are done ------------------
    @pl.when(i == pl.num_programs(0) - 1)
    def _():
        h1_all = h1_ref[...]                                                # [Nd1, H*C]
        xp2 = jnp.dot(h1_all, w2_ref[...],
                      preferred_element_type=jnp.float32)                   # [Nd1, OUTP]
        a2 = jnp.sum(xp2 * att2_ref[...], axis=1, keepdims=True)            # [Nd1, 1]
        a2 = jnp.where(a2 > 0, a2, neg_slope * a2)
        m2 = jnp.max(a2, axis=0, keepdims=True)
        e2 = jnp.exp(a2 - m2)                                               # [Nd1, 1]
        xps2 = xp2 * e2
        adj2 = adj2_ref[...].astype(jnp.float32)
        num2 = jnp.dot(adj2, xps2, preferred_element_type=jnp.float32)      # [Nd2, OUTP]
        den2 = jnp.dot(adj2, e2, preferred_element_type=jnp.float32)        # [Nd2, 1]
        inv2 = pl.reciprocal(jnp.maximum(den2, 1e-30), approx=True)
        h2 = num2 * inv2 + b2_ref[...]             # heads=1, concat=False -> mean == identity

        # log_softmax over the first `out_channels` (real) columns only
        col = lax.broadcasted_iota(jnp.int32, h2.shape, 1)
        valid = col < out_channels
        neg = jnp.float32(-1e30)
        mrow = jnp.max(jnp.where(valid, h2, neg), axis=1, keepdims=True)
        z = h2 - mrow
        p = jnp.exp(jnp.where(valid, z, neg))
        lse = jnp.log(jnp.sum(p, axis=1, keepdims=True))
        out_ref[...] = jnp.where(valid, z - lse, 0.0)


def gatnet_forward(x_all, n_id, edge_index1, size1, edge_index2, size2, params,
                   *, dst_tile=256):
    """GATNet.forward(x, data_flow).  edge_index*: [2, E] (row0=src, row1=dst),
    size* = (N_src, N_dst).  Gather + dense adjacency build is plain JAX glue."""
    w1, att1, b1, w2, att2, b2 = params
    heads, c1 = att1.shape
    hc = heads * c1
    out_channels = w2.shape[1]

    n_src1, n_dst1 = size1
    n_src2, n_dst2 = size2                      # n_src2 == n_dst1 (NeighborSampler)

    # padded / tiled sizes
    tile = min(_round_up(dst_tile, 8), _round_up(n_dst1, 8))
    n_dst1_p = _round_up(n_dst1, tile)
    n_src1_p = _round_up(n_src1, 8)
    n_dst2_p = _round_up(n_dst2, 8)
    out_p = _round_up(out_channels, 128)        # lane-dense output width

    # glue: gather + dense adjacency masks (bf16 halves DMA; 0/1 exact in bf16)
    x0 = x_all[n_id].astype(jnp.float32)
    x0 = jnp.pad(x0, ((0, n_src1_p - n_src1), (0, 0)))
    adj1 = jnp.zeros((n_dst1_p, n_src1_p), jnp.float32).at[
        edge_index1[1], edge_index1[0]].set(1.0).astype(jnp.bfloat16)
    adj2 = jnp.zeros((n_dst2_p, n_dst1_p), jnp.float32).at[
        edge_index2[1], edge_index2[0]].set(1.0).astype(jnp.bfloat16)

    # layer-1 factorized attention params
    eye_rep = jnp.repeat(jnp.eye(heads, dtype=jnp.float32), c1, axis=0)     # [H*C, H]
    s1 = eye_rep * att1.reshape(hc, 1).astype(jnp.float32)                  # logit selector
    r1 = eye_rep.T                                                          # per-head lane broadcaster [H, H*C]
    b1r = b1.reshape(1, hc).astype(jnp.float32)

    # layer-2 params padded to lane-dense width (extra cols are zero -> inert)
    w2p = jnp.pad(w2.astype(jnp.float32), ((0, 0), (0, out_p - out_channels)))
    att2p = jnp.pad(att2.reshape(1, -1).astype(jnp.float32),
                    ((0, 0), (0, out_p - out_channels)))
    b2p = jnp.pad(b2.reshape(1, -1).astype(jnp.float32),
                  ((0, 0), (0, out_p - out_channels)))

    grid = (n_dst1_p // tile,)

    def full(arr):
        return pl.BlockSpec(arr.shape, lambda i: (0, 0))

    kernel = functools.partial(gatnet_kernel, out_channels=out_channels)
    out = pl.pallas_call(
        kernel,
        out_shape=jax.ShapeDtypeStruct((n_dst2_p, out_p), jnp.float32),
        grid=grid,
        in_specs=[
            full(x0), full(w1), full(s1), full(r1), full(b1r),
            pl.BlockSpec((tile, n_src1_p), lambda i: (i, 0)),   # adj1: streamed per dst tile
            full(w2p), full(att2p), full(b2p), full(adj2),
        ],
        out_specs=pl.BlockSpec((n_dst2_p, out_p), lambda i: (0, 0)),
        scratch_shapes=[
            pltpu.VMEM((n_src1_p, hc), jnp.float32),      # exp-scaled source features
            pltpu.VMEM((n_src1_p, heads), jnp.float32),   # per-source exp(attention)
            pltpu.VMEM((n_dst1_p, hc), jnp.float32),      # layer-1 output, stays on-chip
        ],
        compiler_params=pltpu.CompilerParams(
            # layer 2 (last grid step) reads ALL h1 tiles from scratch, so the
            # dst-1 axis carries a dependency and must be "arbitrary".
            dimension_semantics=("arbitrary",),
        ),
    )(x0, w1.astype(jnp.float32), s1, r1, b1r, adj1, w2p, att2p, b2p, adj2)

    return out[:n_dst2, :out_channels]


if __name__ == "__main__":
    key = jax.random.PRNGKey(0)
    keys = jax.random.split(key, 12)

    in_channels, out_channels, heads = 32, 7, 8
    c1 = 128 // heads                                            # 16 per head

    # Synthetic NeighborSampler data_flow with two blocks.
    N_total = 40
    n_src1, n_dst1 = 24, 16                                      # data_flow[0].size
    n_src2, n_dst2 = 16, 8                                       # data_flow[1].size (n_src2 == n_dst1)

    x_all = jax.random.normal(keys[0], (N_total, in_channels), jnp.float32)
    n_id = jax.random.permutation(keys[1], N_total)[:n_src1]     # data_flow[0].n_id

    # Block edges: self-edges for every target plus random neighbor edges.
    e1_src = jnp.concatenate([jnp.arange(n_dst1),
                              jax.random.randint(keys[2], (48,), 0, n_src1)])
    e1_dst = jnp.concatenate([jnp.arange(n_dst1),
                              jax.random.randint(keys[3], (48,), 0, n_dst1)])
    edge_index1 = jnp.stack([e1_src, e1_dst]).astype(jnp.int32)

    e2_src = jnp.concatenate([jnp.arange(n_dst2),
                              jax.random.randint(keys[4], (32,), 0, n_src2)])
    e2_dst = jnp.concatenate([jnp.arange(n_dst2),
                              jax.random.randint(keys[5], (32,), 0, n_dst2)])
    edge_index2 = jnp.stack([e2_src, e2_dst]).astype(jnp.int32)

    # Deterministic synthetic parameters (GATConv shapes).
    w1 = jax.random.normal(keys[6], (in_channels, heads * c1), jnp.float32) / jnp.sqrt(in_channels)
    att1 = jax.random.normal(keys[7], (heads, c1), jnp.float32) * 0.2
    b1 = jax.random.normal(keys[8], (heads * c1,), jnp.float32) * 0.01
    w2 = jax.random.normal(keys[9], (heads * c1, out_channels), jnp.float32) / jnp.sqrt(heads * c1)
    att2 = jax.random.normal(keys[10], (1, out_channels), jnp.float32) * 0.2
    b2 = jax.random.normal(keys[11], (out_channels,), jnp.float32) * 0.01
    params = (w1, att1, b1, w2, att2, b2)

    # dst_tile=8 -> grid of 2 over layer-1 destination tiles (exercises the
    # phase-0 / per-tile / finalize paths).  Use larger tiles for real graphs.
    out = gatnet_forward(x_all, n_id,
                         edge_index1, (n_src1, n_dst1),
                         edge_index2, (n_src2, n_dst2),
                         params, dst_tile=8)
    out = jax.block_until_ready(out)

    assert out.shape == (n_dst2, out_channels)
    assert bool(jnp.all(jnp.isfinite(out)))
    # log_softmax rows should exponentiate-sum to ~1
    assert bool(jnp.all(jnp.abs(jnp.sum(jnp.exp(out), axis=1) - 1.0) < 1e-4))
    print("KERNEL_OK")
</pallas_src>

<mosaic_0001>
module attributes {stable_mosaic.version = 11 : i64} {
  func.func @gatnet_kernel(%arg0: i32, %arg1: memref<24x32xf32, #tpu.memory_space<vmem>>, %arg2: memref<32x128xf32, #tpu.memory_space<vmem>>, %arg3: memref<128x8xf32, #tpu.memory_space<vmem>>, %arg4: memref<8x128xf32, #tpu.memory_space<vmem>>, %arg5: memref<1x128xf32, #tpu.memory_space<vmem>>, %arg6: memref<8x24xbf16, #tpu.memory_space<vmem>>, %arg7: memref<128x128xf32, #tpu.memory_space<vmem>>, %arg8: memref<1x128xf32, #tpu.memory_space<vmem>>, %arg9: memref<1x128xf32, #tpu.memory_space<vmem>>, %arg10: memref<8x16xbf16, #tpu.memory_space<vmem>>, %arg11: memref<8x128xf32, #tpu.memory_space<vmem>>, %arg12: memref<24x128xf32, #tpu.memory_space<vmem>>, %arg13: memref<24x8xf32, #tpu.memory_space<vmem>>, %arg14: memref<16x128xf32, #tpu.memory_space<vmem>>) attributes {dimension_semantics = [#tpu.dimension_semantics<arbitrary>], iteration_bounds = array<i64: 2>, scalar_prefetch = 0 : i64, scratch_operands = 3 : i64, tpu.core_type = #tpu.core_type<tc>, window_params = [{pipeline_mode = #tpu.pipeline_mode<synchronous>, transform_indices = @transform_0, window_bounds = array<i64: 24, 32>}, {pipeline_mode = #tpu.pipeline_mode<synchronous>, transform_indices = @transform_1, window_bounds = array<i64: 32, 128>}, {pipeline_mode = #tpu.pipeline_mode<synchronous>, transform_indices = @transform_2, window_bounds = array<i64: 128, 8>}, {pipeline_mode = #tpu.pipeline_mode<synchronous>, transform_indices = @transform_3, window_bounds = array<i64: 8, 128>}, {pipeline_mode = #tpu.pipeline_mode<synchronous>, transform_indices = @transform_4, window_bounds = array<i64: 1, 128>}, {transform_indices = @transform_5, window_bounds = array<i64: 8, 24>}, {pipeline_mode = #tpu.pipeline_mode<synchronous>, transform_indices = @transform_6, window_bounds = array<i64: 128, 128>}, {pipeline_mode = #tpu.pipeline_mode<synchronous>, transform_indices = @transform_7, window_bounds = array<i64: 1, 128>}, {pipeline_mode = #tpu.pipeline_mode<synchronous>, transform_indices = @transform_8, window_bounds = array<i64: 1, 128>}, {pipeline_mode = #tpu.pipeline_mode<synchronous>, transform_indices = @transform_9, window_bounds = array<i64: 8, 16>}, {pipeline_mode = #tpu.pipeline_mode<synchronous>, transform_indices = @transform_10, window_bounds = array<i64: 8, 128>}]} {
    %c0_i32 = arith.constant 0 : i32
    %0 = arith.cmpi eq, %arg0, %c0_i32 : i32
    %1 = arith.extui %0 : i1 to i32
    %c0_i32_0 = arith.constant 0 : i32
    %2 = arith.cmpi ne, %1, %c0_i32_0 : i32
    scf.if %2 {
      %c0_18 = arith.constant 0 : index
      %c0_19 = arith.constant 0 : index
      %33 = vector.load %arg1[%c0_18, %c0_19] : memref<24x32xf32, #tpu.memory_space<vmem>>, vector<24x32xf32>
      %c0_20 = arith.constant 0 : index
      %c0_21 = arith.constant 0 : index
      %34 = vector.load %arg2[%c0_20, %c0_21] : memref<32x128xf32, #tpu.memory_space<vmem>>, vector<32x128xf32>
      %cst_22 = arith.constant dense<0.000000e+00> : vector<24x128xf32>
      %35 = tpu.matmul %33, %34, %cst_22 {dimension_numbers = #tpu.dot_dimension_numbers<[1], [0], [0], [1], [0, 0, 1, 1], [], []>} : vector<24x32xf32>, vector<32x128xf32>, vector<24x128xf32> -> vector<24x128xf32>
      %c0_23 = arith.constant 0 : index
      %c0_24 = arith.constant 0 : index
      %36 = vector.load %arg3[%c0_23, %c0_24] : memref<128x8xf32, #tpu.memory_space<vmem>>, vector<128x8xf32>
      %cst_25 = arith.constant dense<0.000000e+00> : vector<24x8xf32>
      %37 = tpu.matmul %35, %36, %cst_25 {dimension_numbers = #tpu.dot_dimension_numbers<[1], [0], [0], [1], [0, 0, 1, 1], [], []>} : vector<24x128xf32>, vector<128x8xf32>, vector<24x8xf32> -> vector<24x8xf32>
      %cst_26 = arith.constant 0.000000e+00 : f32
      %38 = vector.broadcast %cst_26 : f32 to vector<24x8xf32>
      %39 = arith.cmpf ogt, %37, %38 : vector<24x8xf32>
      %cst_27 = arith.constant 2.000000e-01 : f32
      %40 = vector.broadcast %cst_27 : f32 to vector<24x8xf32>
      %41 = arith.mulf %40, %37 : vector<24x8xf32>
      %42 = arith.select %39, %37, %41 : vector<24x8xi1>, vector<24x8xf32>
      %cst_28 = arith.constant dense<0xFF800000> : vector<8xf32>
      %43 = vector.multi_reduction <maximumf>, %42, %cst_28 [0] : vector<24x8xf32> to vector<8xf32>
      %44 = vector.shape_cast %43 : vector<8xf32> to vector<1x8xf32>
      %45 = vector.broadcast %44 : vector<1x8xf32> to vector<24x8xf32>
      %46 = arith.subf %42, %45 : vector<24x8xf32>
      %47 = math.exp %46 : vector<24x8xf32>
      %c0_29 = arith.constant 0 : index
      %c0_30 = arith.constant 0 : index
      %48 = vector.load %arg13[%c0_29, %c0_30] : memref<24x8xf32, #tpu.memory_space<vmem>>, vector<24x8xf32>
      tpu.vector_store %arg13[%c0_29, %c0_30], %47 {strides = array<i32>} : memref<24x8xf32, #tpu.memory_space<vmem>>, vector<24x8xf32>,
      %c0_31 = arith.constant 0 : index
      %c0_32 = arith.constant 0 : index
      %49 = vector.load %arg4[%c0_31, %c0_32] : memref<8x128xf32, #tpu.memory_space<vmem>>, vector<8x128xf32>
      %cst_33 = arith.constant dense<0.000000e+00> : vector<24x128xf32>
      %50 = tpu.matmul %47, %49, %cst_33 {dimension_numbers = #tpu.dot_dimension_numbers<[1], [0], [0], [1], [0, 0, 1, 1], [], []>} : vector<24x8xf32>, vector<8x128xf32>, vector<24x128xf32> -> vector<24x128xf32>
      %51 = arith.mulf %35, %50 : vector<24x128xf32>
      %c0_34 = arith.constant 0 : index
      %c0_35 = arith.constant 0 : index
      %52 = vector.load %arg12[%c0_34, %c0_35] : memref<24x128xf32, #tpu.memory_space<vmem>>, vector<24x128xf32>
      tpu.vector_store %arg12[%c0_34, %c0_35], %51 {strides = array<i32>} : memref<24x128xf32, #tpu.memory_space<vmem>>, vector<24x128xf32>,
    } else {
    }
    %c0 = arith.constant 0 : index
    %c0_1 = arith.constant 0 : index
    %3 = vector.load %arg6[%c0, %c0_1] : memref<8x24xbf16, #tpu.memory_space<vmem>>, vector<8x24xbf16>
    %4 = arith.extf %3 : vector<8x24xbf16> to vector<8x24xf32>
    %c0_2 = arith.constant 0 : index
    %c0_3 = arith.constant 0 : index
    %5 = vector.load %arg12[%c0_2, %c0_3] : memref<24x128xf32, #tpu.memory_space<vmem>>, vector<24x128xf32>
    %cst = arith.constant dense<0.000000e+00> : vector<8x128xf32>
    %6 = tpu.matmul %4, %5, %cst {dimension_numbers = #tpu.dot_dimension_numbers<[1], [0], [0], [1], [0, 0, 1, 1], [], []>} : vector<8x24xf32>, vector<24x128xf32>, vector<8x128xf32> -> vector<8x128xf32>
    %c0_4 = arith.constant 0 : index
    %c0_5 = arith.constant 0 : index
    %7 = vector.load %arg13[%c0_4, %c0_5] : memref<24x8xf32, #tpu.memory_space<vmem>>, vector<24x8xf32>
    %cst_6 = arith.constant dense<0.000000e+00> : vector<8x8xf32>
    %8 = tpu.matmul %4, %7, %cst_6 {dimension_numbers = #tpu.dot_dimension_numbers<[1], [0], [0], [1], [0, 0, 1, 1], [], []>} : vector<8x24xf32>, vector<24x8xf32>, vector<8x8xf32> -> vector<8x8xf32>
    %cst_7 = arith.constant 1.000000e-30 : f32
    %9 = vector.broadcast %cst_7 : f32 to vector<8x8xf32>
    %10 = arith.maximumf %8, %9 : vector<8x8xf32>
    %11 = tpu.reciprocal %10 {approx = true} : vector<8x8xf32> -> vector<8x8xf32>
    %c0_8 = arith.constant 0 : index
    %c0_9 = arith.constant 0 : index
    %12 = vector.load %arg4[%c0_8, %c0_9] : memref<8x128xf32, #tpu.memory_space<vmem>>, vector<8x128xf32>
    %cst_10 = arith.constant dense<0.000000e+00> : vector<8x128xf32>
    %13 = tpu.matmul %11, %12, %cst_10 {dimension_numbers = #tpu.dot_dimension_numbers<[1], [0], [0], [1], [0, 0, 1, 1], [], []>} : vector<8x8xf32>, vector<8x128xf32>, vector<8x128xf32> -> vector<8x128xf32>
    %14 = arith.mulf %6, %13 : vector<8x128xf32>
    %c0_11 = arith.constant 0 : index
    %c0_12 = arith.constant 0 : index
    %15 = vector.load %arg5[%c0_11, %c0_12] : memref<1x128xf32, #tpu.memory_space<vmem>>, vector<1x128xf32>
    %16 = vector.broadcast %15 : vector<1x128xf32> to vector<8x128xf32>
    %17 = arith.addf %14, %16 : vector<8x128xf32>
    %cst_13 = arith.constant 0.000000e+00 : f32
    %18 = vector.broadcast %cst_13 : f32 to vector<8x128xf32>
    %19 = arith.cmpf ogt, %17, %18 : vector<8x128xf32>
    %cst_14 = arith.constant 0.000000e+00 : f32
    %20 = vector.broadcast %cst_14 : f32 to vector<8x128xf32>
    %21 = arith.minimumf %17, %20 : vector<8x128xf32>
    %22 = math.exp %21 : vector<8x128xf32>
    %cst_15 = arith.constant 1.000000e+00 : f32
    %23 = vector.broadcast %cst_15 : f32 to vector<8x128xf32>
    %24 = arith.subf %22, %23 : vector<8x128xf32>
    %25 = arith.select %19, %17, %24 : vector<8x128xi1>, vector<8x128xf32>
    %c8_i32 = arith.constant 8 : i32
    %26 = arith.muli %arg0, %c8_i32 : i32
    %27 = tpu.assume_multiple %26, 8 : i32
    %28 = arith.index_cast %27 : i32 to index
    %c0_16 = arith.constant 0 : index
    %29 = vector.load %arg14[%28, %c0_16] : memref<16x128xf32, #tpu.memory_space<vmem>>, vector<8x128xf32>
    tpu.vector_store %arg14[%28, %c0_16], %25 {strides = array<i32>} : memref<16x128xf32, #tpu.memory_space<vmem>>, vector<8x128xf32>,
    %c1_i32 = arith.constant 1 : i32
    %30 = arith.cmpi eq, %arg0, %c1_i32 : i32
    %31 = arith.extui %30 : i1 to i32
    %c0_i32_17 = arith.constant 0 : i32
    %32 = arith.cmpi ne, %31, %c0_i32_17 : i32
    scf.if %32 {
      %c0_18 = arith.constant 0 : index
      %c0_19 = arith.constant 0 : index
      %33 = vector.load %arg14[%c0_18, %c0_19] : memref<16x128xf32, #tpu.memory_space<vmem>>, vector<16x128xf32>
      %c0_20 = arith.constant 0 : index
      %c0_21 = arith.constant 0 : index
      %34 = vector.load %arg7[%c0_20, %c0_21] : memref<128x128xf32, #tpu.memory_space<vmem>>, vector<128x128xf32>
      %cst_22 = arith.constant dense<0.000000e+00> : vector<16x128xf32>
      %35 = tpu.matmul %33, %34, %cst_22 {dimension_numbers = #tpu.dot_dimension_numbers<[1], [0], [0], [1], [0, 0, 1, 1], [], []>} : vector<16x128xf32>, vector<128x128xf32>, vector<16x128xf32> -> vector<16x128xf32>
      %c0_23 = arith.constant 0 : index
      %c0_24 = arith.constant 0 : index
      %36 = vector.load %arg8[%c0_23, %c0_24] : memref<1x128xf32, #tpu.memory_space<vmem>>, vector<1x128xf32>
      %37 = vector.broadcast %36 : vector<1x128xf32> to vector<16x128xf32>
      %38 = arith.mulf %35, %37 : vector<16x128xf32>
      %cst_25 = arith.constant dense<0.000000e+00> : vector<16xf32>
      %39 = vector.multi_reduction <add>, %38, %cst_25 [1] : vector<16x128xf32> to vector<16xf32>
      %40 = vector.shape_cast %39 : vector<16xf32> to vector<16x1xf32>
      %cst_26 = arith.constant 0.000000e+00 : f32
      %41 = vector.broadcast %cst_26 : f32 to vector<16x1xf32>
      %42 = arith.cmpf ogt, %40, %41 : vector<16x1xf32>
      %cst_27 = arith.constant 2.000000e-01 : f32
      %43 = vector.broadcast %cst_27 : f32 to vector<16x1xf32>
      %44 = arith.mulf %43, %40 : vector<16x1xf32>
      %45 = arith.select %42, %40, %44 : vector<16x1xi1>, vector<16x1xf32>
      %cst_28 = arith.constant dense<0xFF800000> : vector<1xf32>
      %46 = vector.multi_reduction <maximumf>, %45, %cst_28 [0] : vector<16x1xf32> to vector<1xf32>
      %47 = vector.shape_cast %46 : vector<1xf32> to vector<1x1xf32>
      %48 = vector.broadcast %47 : vector<1x1xf32> to vector<16x1xf32>
      %49 = arith.subf %45, %48 : vector<16x1xf32>
      %50 = math.exp %49 : vector<16x1xf32>
      %51 = vector.broadcast %50 : vector<16x1xf32> to vector<16x128xf32>
      %52 = arith.mulf %35, %51 : vector<16x128xf32>
      %c0_29 = arith.constant 0 : index
      %c0_30 = arith.constant 0 : index
      %53 = vector.load %arg10[%c0_29, %c0_30] : memref<8x16xbf16, #tpu.memory_space<vmem>>, vector<8x16xbf16>
      %54 = arith.extf %53 : vector<8x16xbf16> to vector<8x16xf32>
      %cst_31 = arith.constant dense<0.000000e+00> : vector<8x128xf32>
      %55 = tpu.matmul %54, %52, %cst_31 {dimension_numbers = #tpu.dot_dimension_numbers<[1], [0], [0], [1], [0, 0, 1, 1], [], []>} : vector<8x16xf32>, vector<16x128xf32>, vector<8x128xf32> -> vector<8x128xf32>
      %cst_32 = arith.constant dense<0.000000e+00> : vector<8x1xf32>
      %56 = tpu.matmul %54, %50, %cst_32 {dimension_numbers = #tpu.dot_dimension_numbers<[1], [0], [0], [1], [0, 0, 1, 1], [], []>} : vector<8x16xf32>, vector<16x1xf32>, vector<8x1xf32> -> vector<8x1xf32>
      %cst_33 = arith.constant 1.000000e-30 : f32
      %57 = vector.broadcast %cst_33 : f32 to vector<8x1xf32>
      %58 = arith.maximumf %56, %57 : vector<8x1xf32>
      %59 = tpu.reciprocal %58 {approx = true} : vector<8x1xf32> -> vector<8x1xf32>
      %60 = vector.broadcast %59 : vector<8x1xf32> to vector<8x128xf32>
      %61 = arith.mulf %55, %60 : vector<8x128xf32>
      %c0_34 = arith.constant 0 : index
      %c0_35 = arith.constant 0 : index
      %62 = vector.load %arg9[%c0_34, %c0_35] : memref<1x128xf32, #tpu.memory_space<vmem>>, vector<1x128xf32>
      %63 = vector.broadcast %62 : vector<1x128xf32> to vector<8x128xf32>
      %64 = arith.addf %61, %63 : vector<8x128xf32>
      %65 = tpu.iota {dimensions = array<i32: 1>} : vector<8x128xi32>
      %c7_i32 = arith.constant 7 : i32
      %66 = vector.broadcast %c7_i32 : i32 to vector<8x128xi32>
      %67 = arith.cmpi slt, %65, %66 : vector<8x128xi32>
      %cst_36 = arith.constant -1.000000e+30 : f32
      %68 = vector.broadcast %cst_36 : f32 to vector<8x128xf32>
      %69 = arith.select %67, %64, %68 : vector<8x128xi1>, vector<8x128xf32>
      %cst_37 = arith.constant dense<0xFF800000> : vector<8xf32>
      %70 = vector.multi_reduction <maximumf>, %69, %cst_37 [1] : vector<8x128xf32> to vector<8xf32>
      %71 = vector.shape_cast %70 : vector<8xf32> to vector<8x1xf32>
      %72 = vector.broadcast %71 : vector<8x1xf32> to vector<8x128xf32>
      %73 = arith.subf %64, %72 : vector<8x128xf32>
      %cst_38 = arith.constant -1.000000e+30 : f32
      %74 = vector.broadcast %cst_38 : f32 to vector<8x128xf32>
      %75 = arith.select %67, %73, %74 : vector<8x128xi1>, vector<8x128xf32>
      %76 = math.exp %75 : vector<8x128xf32>
      %cst_39 = arith.constant dense<0.000000e+00> : vector<8xf32>
      %77 = vector.multi_reduction <add>, %76, %cst_39 [1] : vector<8x128xf32> to vector<8xf32>
      %78 = vector.shape_cast %77 : vector<8xf32> to vector<8x1xf32>
      %79 = math.log %78 : vector<8x1xf32>
      %80 = vector.broadcast %79 : vector<8x1xf32> to vector<8x128xf32>
      %81 = arith.subf %73, %80 : vector<8x128xf32>
      %cst_40 = arith.constant 0.000000e+00 : f32
      %82 = vector.broadcast %cst_40 : f32 to vector<8x128xf32>
      %83 = arith.select %67, %81, %82 : vector<8x128xi1>, vector<8x128xf32>
      %c0_41 = arith.constant 0 : index
      %c0_42 = arith.constant 0 : index
      %84 = vector.load %arg11[%c0_41, %c0_42] : memref<8x128xf32, #tpu.memory_space<vmem>>, vector<8x128xf32>
      tpu.vector_store %arg11[%c0_41, %c0_42], %83 {strides = array<i32>} : memref<8x128xf32, #tpu.memory_space<vmem>>, vector<8x128xf32>,
    } else {
    }
    return
  }
  func.func @transform_0(%arg0: i32) -> (i32, i32) {
    %c0_i32 = arith.constant 0 : i32
    %c0_i32_0 = arith.constant 0 : i32
    %c0_i32_1 = arith.constant 0 : i32
    return %c0_i32, %c0_i32_0 : i32, i32
  }
  func.func @transform_1(%arg0: i32) -> (i32, i32) {
    %c0_i32 = arith.constant 0 : i32
    %c0_i32_0 = arith.constant 0 : i32
    %c0_i32_1 = arith.constant 0 : i32
    return %c0_i32, %c0_i32_0 : i32, i32
  }
  func.func @transform_2(%arg0: i32) -> (i32, i32) {
    %c0_i32 = arith.constant 0 : i32
    %c0_i32_0 = arith.constant 0 : i32
    %c0_i32_1 = arith.constant 0 : i32
    return %c0_i32, %c0_i32_0 : i32, i32
  }
  func.func @transform_3(%arg0: i32) -> (i32, i32) {
    %c0_i32 = arith.constant 0 : i32
    %c0_i32_0 = arith.constant 0 : i32
    %c0_i32_1 = arith.constant 0 : i32
    return %c0_i32, %c0_i32_0 : i32, i32
  }
  func.func @transform_4(%arg0: i32) -> (i32, i32) {
    %c0_i32 = arith.constant 0 : i32
    %c0_i32_0 = arith.constant 0 : i32
    %c0_i32_1 = arith.constant 0 : i32
    return %c0_i32, %c0_i32_0 : i32, i32
  }
  func.func @transform_5(%arg0: i32) -> (i32, i32) {
    %c0_i32 = arith.constant 0 : i32
    %c0_i32_0 = arith.constant 0 : i32
    return %arg0, %c0_i32 : i32, i32
  }
  func.func @transform_6(%arg0: i32) -> (i32, i32) {
    %c0_i32 = arith.constant 0 : i32
    %c0_i32_0 = arith.constant 0 : i32
    %c0_i32_1 = arith.constant 0 : i32
    return %c0_i32, %c0_i32_0 : i32, i32
  }
  func.func @transform_7(%arg0: i32) -> (i32, i32) {
    %c0_i32 = arith.constant 0 : i32
    %c0_i32_0 = arith.constant 0 : i32
    %c0_i32_1 = arith.constant 0 : i32
    return %c0_i32, %c0_i32_0 : i32, i32
  }
  func.func @transform_8(%arg0: i32) -> (i32, i32) {
    %c0_i32 = arith.constant 0 : i32
    %c0_i32_0 = arith.constant 0 : i32
    %c0_i32_1 = arith.constant 0 : i32
    return %c0_i32, %c0_i32_0 : i32, i32
  }
  func.func @transform_9(%arg0: i32) -> (i32, i32) {
    %c0_i32 = arith.constant 0 : i32
    %c0_i32_0 = arith.constant 0 : i32
    %c0_i32_1 = arith.constant 0 : i32
    return %c0_i32, %c0_i32_0 : i32, i32
  }
  func.func @transform_10(%arg0: i32) -> (i32, i32) {
    %c0_i32 = arith.constant 0 : i32
    %c0_i32_0 = arith.constant 0 : i32
    %c0_i32_1 = arith.constant 0 : i32
    return %c0_i32, %c0_i32_0 : i32, i32
  }
}

</mosaic_0001>

<bundles_post_ra>
// kernel: tpu_custom_call.1
= control target key start
LH: loop header
LB: loop body
LE: loop exit
PB: predicated region body
PF: predicated region fallthrough
CT: control target
= control target key end

     0   :  { %15 = vsyncpa [#allocation6], 0  ;;  %s2202_s0 = inlined_call_operand.hbm [shape: f32[24,32], index: 0, kind: input, shape index: {}]   ;;  %s2203_s1 = inlined_call_operand.hbm [shape: f32[32,128], index: 1, kind: input, shape index: {}]   ;;  %s2204_s2 = inlined_call_operand.vmem [shape: f32[128,8], index: 2, kind: input, shape index: {}]   ;;  %s2205_s3 = inlined_call_operand.vmem [shape: f32[8,128], index: 3, kind: input, shape index: {}]   ;;  %s2206_s4 = inlined_call_operand.hbm [shape: f32[1,128], index: 4, kind: input, shape index: {}]   ;;  %s2207_s5 = inlined_call_operand.vmem [shape: bf16[16,24], index: 5, kind: input, shape index: {}]   ;;  %s2208_s6 = inlined_call_operand.vmem [shape: f32[128,128], index: 6, kind: input, shape index: {}]   ;;  %s2209_s7 = inlined_call_operand.hbm [shape: f32[1,128], index: 7, kind: input, shape index: {}]   ;;  %s2210_s8 = inlined_call_operand.vmem [shape: f32[1,128], index: 8, kind: input, shape index: {}]   ;;  %s2211_s9 = inlined_call_operand.vmem [shape: bf16[8,16], index: 9, kind: input, shape index: {}]   ;;  %s2212_s10 = inlined_call_operand.hbm [shape: f32[8,128], index: 10, kind: output, shape index: {}]  }
   0x1   :  { %16 = vsyncpa [#allocation9], 0 }
   0x2   :  { %17 = vsyncpa [#allocation12], 0 }
   0x3   :  { %18 = vsyncpa [#allocation7], 0  ;;  %s1918_s13 = smov 0  }
   0x4 LB: > { %s1924_s14 = sadd.s32 4294967295, %s1847_s13   ;;  %p1371_p0 = scmp.ge.s32.totalorder %s1847_s13, 1  ;;  %s1847_s13 = sphi %s1918_s13, %s24_s13  }
   0x5   : > { %p265_p1 = scmp.lt.s32.totalorder %s1847_s13, 3  ;;  %p1372_p2 = scmp.ne.s32.totalorder %s1924_s14, 0 }
   0x6   : > { %p1643_p3 = scmp.eq.s32.totalorder %s1924_s14, 0  ;;  %s1849_s16 = smov [#allocation8]  }
   0x7   : > { %p1930_p4 = pnand %p1371_p0, %p265_p1  ;;  %s290_s17 = sshll.u32 %s1849_s16, 4  ;;  %s291_s17 = int_to_ptr.vmem [resolvable:$true] %s290_s17 }
   0x8   : > { %s1850_s18 = smov [#allocation5]   ;;  %s1851_s21 = smov [#allocation10]  }
   0x9   : > { %p1630_p5 = pneg %p1930_p4  ;;  %s277_s19 = sshll.u32 %s1850_s18, 4  ;;  %s1936_s19 = int_to_ptr.vmem [resolvable:$true] %s277_s19 }
   0xa   : > { %s310_s22 = sshll.u32 %s1851_s21, 4  ;;  %s1852_s23 = smov [#allocation11]   ;;  %s1944_s22 = int_to_ptr.vmem [resolvable:$true] %s310_s22 }
   0xb   : > { %p1940_p6 = pnand %p1643_p3, %p1630_p5  ;;  %s1946_s24 = sshll.u32 %s1852_s23, 4  ;;  %s325_s24 = int_to_ptr.vmem [resolvable:$true] %s1946_s24 }
   0xc   : > { %s1708_s25 = scalar_lea.vmem %s291_s17, 512  ;;  %p1716_p11 = scmp.lt.s32.totalorder %s291_s17, %s291_s17 }
   0xd   : > { %p1699_p7 = pneg %p1940_p6  ;;  %p1709_p8 = scmp.ne.s32.totalorder %s291_s17, %s1708_s25 }
   0xe   : > { %p1717_p12 = scmp.lt.s32.totalorder %s1708_s25, %s1708_s25 }
   0xf   : > { %p1711_p9 = pnand %p1709_p8, %p1699_p7 }
  0x10   : > { %p1718_p13 = por %p1717_p12, %p1716_p11 }
  0x11   : > { %p1712_p10 = pneg %p1711_p9 }
  0x13   : > { %p1719_p0 = pnand %p1718_p13, %p1712_p10 }
  0x15   : > { %1722 = shalt.err (!%p1719_p0)
}
  0x16   : > { %s1853_s26 = smov 128   ;;  %s1854_s27 = smov 8  }
  0x17   : > { %1636 = dma.hbm_to_vmem [thread:$0]  (!%p1940_p6), %s2203_s1, 512, %s291_s17, [#allocation9], %s1853_s26, %s1853_s26, %s1854_s27  }
  0x18   : > { %s1734_s30 = scalar_lea.vmem %s1936_s19, 384  ;;  %p1742_p9 = scmp.lt.s32.totalorder %s1936_s19, %s1936_s19 }
  0x19   : > { %p1735_p1 = scmp.ne.s32.totalorder %s1936_s19, %s1734_s30  ;;  %p1743_p10 = scmp.lt.s32.totalorder %s1734_s30, %s1734_s30 }
  0x1b   : > { %p1737_p5 = pnand %p1735_p1, %p1699_p7  ;;  %p1744_p11 = por %p1743_p10, %p1742_p9 }
  0x1d   : > { %p1738_p8 = pneg %p1737_p5 }
  0x1f   : > { %p1745_p12 = pnand %p1744_p11, %p1738_p8 }
  0x21   : > { %1748 = shalt.err (!%p1745_p12)
}
  0x22   : > { %1633 = dma.hbm_to_vmem [thread:$0]  (!%p1940_p6), %s2202_s0, 384, %s1936_s19, [#allocation6], %s1853_s26, %s1853_s26, %s1854_s27  }
  0x23   : > { %s1760_s16 = scalar_lea.vmem %s1944_s22, 16  ;;  %s1767_s17 = scalar_lea.vmem %s1944_s22, 32 }
  0x24   : > { %p1761_p13 = scmp.ne.s32.totalorder %s1944_s22, %s1760_s16  ;;  %p1768_p5 = scmp.lt.s32.totalorder %s1944_s22, %s1944_s22 }
  0x25   : > { %p1769_p8 = scmp.lt.s32.totalorder %s1767_s17, %s1760_s16 }
  0x26   : > { %p1763_p0 = pnand %p1761_p13, %p1699_p7 }
  0x27   : > { %p1770_p9 = por %p1769_p8, %p1768_p5 }
  0x28   : > { %p1764_p1 = pneg %p1763_p0 }
  0x2a   : > { %p1771_p10 = pnand %p1770_p9, %p1764_p1 }
  0x2c   : > { %1774 = shalt.err (!%p1771_p10)
}
  0x2d   : > { %1639 = dma.hbm_to_vmem [thread:$0]  (!%p1940_p6), %s2206_s4, 16, %s1944_s22, [#allocation9]  }
  0x2e   : > { %s1786_s19 = scalar_lea.vmem %s325_s24, 16  ;;  %s1793_s23 = scalar_lea.vmem %s325_s24, 32 }
  0x2f   : > { %p1787_p11 = scmp.ne.s32.totalorder %s325_s24, %s1786_s19  ;;  %p1794_p0 = scmp.lt.s32.totalorder %s325_s24, %s325_s24 }
  0x30   : > { %p1795_p1 = scmp.lt.s32.totalorder %s1793_s23, %s1786_s19 }
  0x31   : > { %p1789_p12 = pnand %p1787_p11, %p1699_p7 }
  0x32   : > { %p1796_p5 = por %p1795_p1, %p1794_p0 }
  0x33   : > { %p1790_p13 = pneg %p1789_p12 }
  0x35   : > { %p1797_p8 = pnand %p1796_p5, %p1790_p13 }
  0x37   : > { %1800 = shalt.err (!%p1797_p8)
}
  0x38   : > { %1642 = dma.hbm_to_vmem [thread:$0]  (!%p1940_p6), %s2209_s7, 16, %s325_s24, [#allocation12]  }
  0x39   : > { %350 = sbr.rel (%p1930_p4) target bundleno = 2236 (0x8bc), region = 60 }
  0x3e   : > { %1830 = dma.done.wait (%p1643_p3), [#allocation6], 384  }
  0x3f   : > { %1832 = vsyncadd (%p1643_p3), [#allocation6], 4294966912 }
  0x40   : > { %1834 = dma.done.wait (%p1643_p3), [#allocation9], 528  }
  0x41   : > { %1836 = vsyncadd (%p1643_p3), [#allocation9], 4294966768 }
  0x42   : > { %1838 = dma.done.wait (%p1643_p3), [#allocation12], 16  }
  0x43   : > { %1840 = vsyncadd (%p1643_p3), [#allocation12], 4294967280  ;;  %p394_p4 = scmp.lt.s32.totalorder %s1924_s14, 1 }
  0x44   : > { %401 = sbr.rel (%p1372_p2) target bundleno = 716 (0x2cc), region = 80 }
  0x45   : > { %s395_s15 = scalar_select %p394_p4, %s1924_s14, 1 }
  0x47   : > { %s1382_s20 = sshll.u32 %s395_s15, 2 }
  0x48   : > { %s2013_s27 = scalar_lea.vmem %s2207_s5, %s1382_s20 }
  0x49   : > { %v408_v0 = vld [vmem:[#allocation8 + $0x18] sm:$0xff]  ;;  %v1855_v1 = vmov 0.0   ;;  %v407_v2 = vld [vmem:[#allocation8 + $0x10] sm:$0xff]  ;;  %vm1856_vm0 = vmmov 0   ;;  %v514_v3 = vld [vmem:[%s2204_s2 + $0x78] sm:$0xff]  ;;  %vm409_vm1 = vcmask 261120  }
  0x4a   : > { %1469 = vmatprep.subr.mxu0 %v1855_v1  ;;  %1477 = vmatprep.mubr.msk.f32.mxu0 %vm1856_vm0, %v1855_v1  ;;  %v513_v4 = vld [vmem:[%s2204_s2 + $0x70] sm:$0xff]  ;;  %v406_v5 = vld [vmem:[#allocation8 + $0x8] sm:$0xff]  ;;  %v512_v6 = vld [vmem:[%s2204_s2 + $0x68] sm:$0xff]  ;;  %vm604_vm4 = vcmask 64512  }
  0x4b   : > { %1470 = vmatpush3.msra.mxu0 %v408_v0  ;;  %1486 = vmatprep.subr.mxu1 %v1855_v1  ;;  %v405_v7 = vld [vmem:[#allocation8] sm:$0xff]  ;;  %v402_v8 = vld [vmem:[#allocation5] sm:$0xff]  ;;  %v403_v11 = vld [vmem:[#allocation5 + $0x8] sm:$0xff] }
  0x4c   : > { %1471 = vmatprep.subr.mxu0 %v1855_v1  ;;  %1487 = vmatpush3.msra.mxu1 %v514_v3  ;;  %v511_v9 = vld [vmem:[%s2204_s2 + $0x60] sm:$0xff]  ;;  %v510_v10 = vld [vmem:[%s2204_s2 + $0x58] sm:$0xff]  ;;  %v509_v12 = vld [vmem:[%s2204_s2 + $0x50] sm:$0xff] }
  0x4d   : > { %1472 = vmatpush3.msra.mxu0 %v407_v2  ;;  %1488 = vmatprep.subr.mxu1 %v1855_v1  ;;  %v508_v13 = vld [vmem:[%s2204_s2 + $0x48] sm:$0xff]  ;;  %v404_v14 = vld [vmem:[#allocation5 + $0x10] sm:$0xff]  ;;  %v507_v15 = vld [vmem:[%s2204_s2 + $0x40] sm:$0xff] }
  0x4e   : > { %1473 = vmatprep.subr.mxu0 %v1855_v1  ;;  %1489 = vmatpush3.msra.mxu1 %v513_v4  ;;  %v506_v16 = vld [vmem:[%s2204_s2 + $0x38] sm:$0xff]  ;;  %v505_v17 = vld [vmem:[%s2204_s2 + $0x30] sm:$0xff]  ;;  %v504_v18 = vld [vmem:[%s2204_s2 + $0x28] sm:$0xff] }
  0x4f   : > { %1474 = vmatpush3.msra.mxu0 %v406_v5  ;;  %1490 = vmatprep.subr.mxu1 %v1855_v1  ;;  %v503_v19 = vld [vmem:[%s2204_s2 + $0x20] sm:$0xff]  ;;  %v502_v20 = vld [vmem:[%s2204_s2 + $0x18] sm:$0xff]  ;;  %v501_v21 = vld [vmem:[%s2204_s2 + $0x10] sm:$0xff] }
  0x50   : > { %1475 = vmatprep.subr.mxu0 %v1855_v1  ;;  %1491 = vmatpush3.msra.mxu1 %v512_v6  ;;  %v500_v22 = vld [vmem:[%s2204_s2 + $0x8] sm:$0xff]  ;;  %v499_v23 = vld [vmem:[%s2204_s2] sm:$0xff] }
  0x51   : > { %1476 = vmatpush3.msra.mxu0 %v405_v7  ;;  %1492 = vmatprep.subr.mxu1 %v1855_v1  ;;  %v628_v30 = vld [vmem:[%s2205_s3] sm:$0xff] }
  0x52   : > { %1478 = vmatmul.mubr.msk.f32.vlgmr.msra.gmra.mxu0 %vm409_vm1, %v402_v8  ;;  %1493 = vmatpush3.msra.mxu1 %v511_v9 }
  0x53   : > { %1480 = vmatprep.mubr.msk.f32.mxu0 %vm1856_vm0, %v1855_v1  ;;  %1494 = vmatprep.subr.mxu1 %v1855_v1 }
  0x54   : > { %1495 = vmatpush3.msra.mxu1 %v510_v10  ;;  %1518 = vmatprep.mubr.msk.f32.mxu1 %vm1856_vm0, %v1855_v1 }
  0x55   : > { %1496 = vmatprep.subr.mxu1 %v1855_v1  ;;  %1527 = vmatprep.subr.mxu0 %v1855_v1 }
  0x56   : > { %1481 = vmatmul.mubr.msk.f32.gmra.mxu0 %vm409_vm1, %v403_v11  ;;  %1497 = vmatpush3.msra.mxu1 %v509_v12 }
  0x57   : > { %1483 = vmatprep.mubr.msk.f32.mxu0 %vm1856_vm0, %v1855_v1  ;;  %1498 = vmatprep.subr.mxu1 %v1855_v1 }
  0x58   : > { %1499 = vmatpush3.msra.mxu1 %v508_v13  ;;  %1528 = vmatpush3.msra.mxu0 %v628_v30 }
  0x59   : > { %1500 = vmatprep.subr.mxu1 %v1855_v1 }
  0x5a   : > { %1484 = vmatmul.mubr.msk.f32.gmra.mxu0 %vm409_vm1, %v404_v14  ;;  %1501 = vmatpush3.msra.mxu1 %v507_v15 }
  0x5b   : > { %1502 = vmatprep.subr.mxu1 %v1855_v1  ;;  %1529 = vmatprep.mubr.msk.f32.mxu0 %vm1856_vm0, %v1855_v1 }
  0x5c   : > { %1503 = vmatpush3.msra.mxu1 %v506_v16 }
  0x5d   : > { %1504 = vmatprep.subr.mxu1 %v1855_v1 }
  0x5e   : > { %1505 = vmatpush3.msra.mxu1 %v505_v17 }
  0x5f   : > { %1506 = vmatprep.subr.mxu1 %v1855_v1 }
  0x60   : > { %1507 = vmatpush3.msra.mxu1 %v504_v18 }
  0x61   : > { %1508 = vmatprep.subr.mxu1 %v1855_v1 }
  0x62   : > { %1509 = vmatpush3.msra.mxu1 %v503_v19 }
  0x63   : > { %1510 = vmatprep.subr.mxu1 %v1855_v1 }
  0x64   : > { %1511 = vmatpush3.msra.mxu1 %v502_v20 }
  0x65   : > { %1512 = vmatprep.subr.mxu1 %v1855_v1 }
  0x66   : > { %1513 = vmatpush3.msra.mxu1 %v501_v21 }
  0x67   : > { %1514 = vmatprep.subr.mxu1 %v1855_v1 }
  0x68   : > { %1515 = vmatpush3.msra.mxu1 %v500_v22 }
  0x69   : > { %1516 = vmatprep.subr.mxu1 %v1855_v1 }
  0x6a   : > { %1517 = vmatpush3.msra.mxu1 %v499_v23 }
 0x112   : > { %v485_v24 = vpop.f32.mrf.mxu0 }
 0x113   : > { %1519 = vmatmul.mubr.f32.vlgmr.msra.gmra.mxu1 %v485_v24 }
 0x114   : > { %v1479_v25 = vpop.f32.mrf.mxu0  ;;  %1521 = vmatprep.mubr.msk.f32.mxu1 %vm1856_vm0, %v1855_v1 }
 0x116   : > { %v490_v26 = vpop.f32.mrf.mxu0 }
 0x117   : > { %1522 = vmatmul.mubr.f32.gmra.mxu1 %v490_v26 }
 0x118   : > { %v1482_v27 = vpop.f32.mrf.mxu0  ;;  %1524 = vmatprep.mubr.msk.f32.mxu1 %vm1856_vm0, %v1855_v1 }
 0x11a   : > { %v495_v28 = vpop.f32.mrf.mxu0 }
 0x11b   : > { %1525 = vmatmul.mubr.f32.gmra.mxu1 %v495_v28 }
 0x11c   : > { %v1485_v29 = vpop.f32.mrf.mxu0 }
 0x1d3   : > { %v581_v31 = vpop.f32.mrf.mxu1 }
 0x1d4   : > { %v598_v33 = vmul.f32 0.2, %v581_v31  ;;  %vm595_vm2 = vcmp.gt.f32.partialorder %v581_v31, 0.0 }
 0x1d5   : > { %v1520_v32 = vpop.f32.mrf.mxu1 }
 0x1d6   : > { %v601_v37 = vsel %vm595_vm2, %v581_v31, %v598_v33 }
 0x1d7   : > { %v586_v34 = vpop.f32.mrf.mxu1  ;;  %v605_v42 = vsel %vm604_vm4, %v601_v37, -inf }
 0x1d8   : > { %vm596_vm3 = vcmp.gt.f32.partialorder %v586_v34, 0.0  ;;  %v599_v35 = vmul.f32 0.2, %v586_v34 }
 0x1d9   : > { %v1523_v36 = vpop.f32.mrf.mxu1 }
 0x1da   : > { %v602_v38 = vsel %vm596_vm3, %v586_v34, %v599_v35 }
 0x1db   : > { %v606_v39 = vsel %vm604_vm4, %v602_v38, -inf  ;;  %v591_v40 = vpop.f32.mrf.mxu1 }
 0x1dc   : > { %vm597_vm5 = vcmp.gt.f32.partialorder %v591_v40, 0.0  ;;  %v600_v41 = vmul.f32 0.2, %v591_v40  ;;  %v608_v44 = vmax.f32 %v605_v42, %v606_v39 }
 0x1dd   : > { %v1526_v43 = vpop.f32.mrf.mxu1 }
 0x1de   : > { %v603_v45 = vsel %vm597_vm5, %v591_v40, %v600_v41 }
 0x1df   : > { %v607_v46 = vsel %vm604_vm4, %v603_v45, -inf }
 0x1e0   : > { %v609_v47 = vmax.f32 %v608_v44, %v607_v46 }
 0x1e2   : > { %v610_v48 = vrot.slane %v609_v47, 4 }
 0x1e4   : > { %v611_v49 = vmax.f32 %v609_v47, %v610_v48 }
 0x1e6   : > { %v612_v50 = vrot.slane %v611_v49, 2 }
 0x1e8   : > { %v613_v51 = vmax.f32 %v611_v49, %v612_v50 }
 0x1ea   : > { %v614_v52 = vrot.slane %v613_v51, 1 }
 0x1ec   : > { %v615_v53 = vmax.f32 %v613_v51, %v614_v52 }
 0x1ee   : > { %v616_v54 = vsub.f32 %v601_v37, %v615_v53  ;;  %v617_v55 = vsub.f32 %v602_v38, %v615_v53  ;;  %v618_v56 = vsub.f32 %v603_v45, %v615_v53 }
 0x1f0   : > { %v619_v57 = vmul.f32 1.442695, %v616_v54  ;;  %v621_v58 = vmul.f32 1.442695, %v617_v55  ;;  %v623_v59 = vmul.f32 1.442695, %v618_v56 }
 0x1f2   : > { %1675 = vpow2.f32 %v619_v57 }
 0x1f3   : > { %1677 = vpow2.f32 %v621_v58 }
 0x1f4   : > { %1679 = vpow2.f32 %v623_v59 }
 0x1ff   : > { %v1676_v60 = vpop.eup %1675 }
 0x200   : > { %v1678_v61 = vpop.eup %1677  ;;  %625 = vst.msk [vmem:[#allocation3] sm:$0xff] %vm604_vm4, %v1676_v60  ;;  %1530 = vmatmul.mubr.msk.f32.vlgmr.msra.gmra.mxu0 %vm604_vm4, %v1676_v60 }
 0x201   : > { %v1680_v62 = vpop.eup %1679  ;;  %626 = vst.msk [vmem:[#allocation3 + $0x8] sm:$0xff] %vm604_vm4, %v1678_v61  ;;  %1532 = vmatprep.mubr.msk.f32.mxu0 %vm1856_vm0, %v1855_v1 }
 0x202   : > { %627 = vst.msk [vmem:[#allocation3 + $0x10] sm:$0xff] %vm604_vm4, %v1680_v62 }
 0x204   : > { %1533 = vmatmul.mubr.msk.f32.gmra.mxu0 %vm604_vm4, %v1678_v61 }
 0x205   : > { %1535 = vmatprep.mubr.msk.f32.mxu0 %vm1856_vm0, %v1855_v1 }
 0x208   : > { %1536 = vmatmul.mubr.msk.f32.gmra.mxu0 %vm604_vm4, %v1680_v62 }
 0x2c0   : > { %v704_v63 = vpop.f32.mrf.mxu0 }
 0x2c1   : > { %v718_v0 = vmul.f32 %v704_v63, %v485_v24 }
 0x2c2   : > { %v1531_v2 = vpop.f32.mrf.mxu0 }
 0x2c3   : > { %721 = vst [vmem:[#allocation2 + $0x10] sm:$0xff] %v718_v0 }
 0x2c4   : > { %v709_v3 = vpop.f32.mrf.mxu0 }
 0x2c5   : > { %v719_v4 = vmul.f32 %v709_v3, %v490_v26 }
 0x2c6   : > { %v1534_v5 = vpop.f32.mrf.mxu0 }
 0x2c7   : > { %722 = vst [vmem:[#allocation2] sm:$0xff] %v719_v4 }
 0x2c8   : > { %v714_v6 = vpop.f32.mrf.mxu0 }
 0x2c9   : > { %v720_v7 = vmul.f32 %v714_v6, %v495_v28 }
 0x2ca   : > { %v1537_v8 = vpop.f32.mrf.mxu0 }
 0x2cb   : > { %723 = vst [vmem:[#allocation2 + $0x8] sm:$0xff] %v720_v7 }
 0x2cc PF: > { %v805_v9 = vld [vmem:[#allocation3 + $0x10] sm:$0xff]  ;;  %v1857_v10 = vmov 0.0   ;;  %v804_v1 = vld [vmem:[#allocation3 + $0x8] sm:$0xff]  ;;  %vm1858_vm6 = vmmov 0   ;;  %v803_v12 = vld [vmem:[#allocation3] sm:$0xff]  ;;  %vm729_vm7 = vcmask 195584  }
 0x2cd   : > { %1547 = vmatprep.subr.mxu1 %v1857_v10  ;;  %1553 = vmatprep.mubr.msk.f32.mxu1 %vm1858_vm6, %v1857_v10  ;;  %v724_v11 = vld [vmem:[%s2013_s27] sm:$0xf]  ;;  %v726_v16 = vld [vmem:[#allocation2 + $0x10] sm:$0xff]  ;;  %vm879_vm8 = vcmask 64512   ;;  %v1393_v25 = vld [vmem:[#allocation10] ss:$0 sm:$0xff] }
 0x2ce   : > { %1548 = vmatpush3.msra.mxu1 %v805_v9  ;;  %1538 = vmatprep.subr.mxu0 %v1857_v10  ;;  %v725_v13 = vunpack.c.l.bf16 %v724_v11  ;;  %v727_v15 = vld [vmem:[#allocation2] sm:$0xff]  ;;  %s1395_s29 = sshll.u32 %s1924_s14, 3  ;;  %p1396_p2 = scmp.ne.s32.totalorder %s1924_s14, 1 }
 0x2cf   : > { %1549 = vmatprep.subr.mxu1 %v1857_v10  ;;  %1544 = vmatprep.mubr.msk.f32.mxu0 %vm1858_vm6, %v1857_v10  ;;  %v878_v17 = vld [vmem:[%s2205_s3] sm:$0xff]  ;;  %s969_s30 = scalar_lea.vmem [#allocation4], %s1395_s29 }
 0x2d0   : > { %1550 = vmatpush3.msra.mxu1 %v804_v1 }
 0x2d1   : > { %1551 = vmatprep.subr.mxu1 %v1857_v10 }
 0x2d2   : > { %1552 = vmatpush3.msra.mxu1 %v803_v12  ;;  %v728_v14 = vld [vmem:[#allocation2 + $0x8] sm:$0xff] }
 0x2d3   : > { %1554 = vmatmul.mubr.msk.f32.vlgmr.msra.gmra.mxu1 %vm729_vm7, %v725_v13  ;;  %1539 = vmatpush3.msra.mxu0 %v728_v14 }
 0x2d4   : > { %1540 = vmatprep.subr.mxu0 %v1857_v10 }
 0x2d5   : > { %1541 = vmatpush3.msra.mxu0 %v727_v15 }
 0x2d6   : > { %1542 = vmatprep.subr.mxu0 %v1857_v10 }
 0x2d7   : > { %1543 = vmatpush3.msra.mxu0 %v726_v16 }
 0x2d8   : > { %1545 = vmatmul.mubr.msk.f32.vlgmr.msra.gmra.mxu0 %vm729_vm7, %v725_v13  ;;  %1556 = vmatprep.subr.mxu0 %v1857_v10 }
 0x2d9   : > { %1557 = vmatpush3.msra.mxu0 %v878_v17  ;;  %1558 = vmatprep.mubr.msk.f32.mxu0 %vm1858_vm6, %v1857_v10 }
 0x393   : > { %v872_v18 = vpop.f32.mrf.mxu1 }
 0x394   : > { %v876_v19 = vmax.f32 %v872_v18, 1e-30 }
 0x395   : > { %v1555_v20 = vpop.f32.mrf.mxu1 }
 0x396   : > { %1681 = vrcp.f32 %v876_v19 }
 0x398   : > { %v799_v22 = vpop.f32.mrf.mxu0 }
 0x39a   : > { %v1546_v23 = vpop.f32.mrf.mxu0 }
 0x3a3   : > { %v1682_v21 = vpop.eup %1681 }
 0x3a4   : > { %1559 = vmatmul.mubr.msk.f32.vlgmr.msra.gmra.mxu0 %vm879_vm8, %v1682_v21 }
 0x464   : > { %v949_v24 = vpop.f32.mrf.mxu0 }
 0x465   : > { %v953_v26 = vmul.f32 %v949_v24, %v799_v22 }
 0x466   : > { %v1560_v27 = vpop.f32.mrf.mxu0 }
 0x467   : > { %v961_v28 = vadd.f32 %v1393_v25, %v953_v26 }
 0x469   : > { %v963_v29 = vmin.f32 %v961_v28, 0.0  ;;  %vm962_vm9 = vcmp.gt.f32.partialorder %v961_v28, 0.0 }
 0x46b   : > { %v964_v30 = vmul.f32 1.442695, %v963_v29 }
 0x46d   : > { %1683 = vpow2.f32 %v964_v30 }
 0x47a   : > { %v1684_v31 = vpop.eup %1683  ;;  %974 = sbr.rel (%p1396_p2) target bundleno = 2221 (0x8ad), region = 84 }
 0x47b   : > { %v1394_v32 = vadd.f32 -1.0, %v1684_v31 }
 0x47d   : > { %v967_v33 = vsel %vm962_vm9, %v961_v28, %v1394_v32 }
 0x47e   : > { %970 = vst [vmem:[%s969_s30] sm:$0xff] %v967_v33 }
 0x47f   : > { %v992_v34 = vld [vmem:[%s2208_s6 + $0x78] sm:$0xff]  ;;  %v991_v35 = vld [vmem:[%s2208_s6 + $0x70] sm:$0xff]  ;;  %v990_v36 = vld [vmem:[%s2208_s6 + $0x68] sm:$0xff]  ;;  %v1859_v57 = vmov 0.0   ;;  %vm1860_vm10 = vmmov 0   ;;  %vm1104_vm13 = vcmask 130048   ;;  %v1264_v24 = vlaneseq }
 0x480   : > { %1561 = vmatprep.subr.mxu0 %v992_v34  ;;  %v989_v37 = vld [vmem:[%s2208_s6 + $0x60] sm:$0xff]  ;;  %v988_v39 = vld [vmem:[%s2208_s6 + $0x58] sm:$0xff]  ;;  %v987_v40 = vld [vmem:[%s2208_s6 + $0x50] sm:$0xff]  ;;  %1596 = vmatprep.subr.mxu1 %v1859_v57  ;;  %v1861_v17 = vmov 0  }
 0x481   : > { %1562 = vmatpush3.msra.mxu0 %v992_v34  ;;  %v986_v41 = vld [vmem:[%s2208_s6 + $0x48] sm:$0xff]  ;;  %v985_v42 = vld [vmem:[%s2208_s6 + $0x40] sm:$0xff]  ;;  %v984_v43 = vld [vmem:[%s2208_s6 + $0x38] sm:$0xff]  ;;  %1600 = vmatprep.mubr.msk.f32.mxu1 %vm1860_vm10, %v1859_v57  ;;  %v1265_v25 = vand.u32 127, %v1264_v24 }
 0x482   : > { %1563 = vmatprep.subr.mxu0 %v991_v35  ;;  %v983_v44 = vld [vmem:[%s2208_s6 + $0x30] sm:$0xff]  ;;  %v982_v45 = vld [vmem:[%s2208_s6 + $0x28] sm:$0xff]  ;;  %v981_v46 = vld [vmem:[%s2208_s6 + $0x20] sm:$0xff]  ;;  %1685 = vset.pattern.permute.xlu1 %v1861_v17 }
 0x483   : > { %1564 = vmatpush3.msra.mxu0 %v991_v35  ;;  %v980_v47 = vld [vmem:[%s2208_s6 + $0x18] sm:$0xff]  ;;  %v979_v48 = vld [vmem:[%s2208_s6 + $0x10] sm:$0xff]  ;;  %v978_v49 = vld [vmem:[%s2208_s6 + $0x8] sm:$0xff]  ;;  %1686 = vset.pattern.permute.xlu0 %v1861_v17  ;;  %vm1266_vm14 = vcmp.lt.s32.totalorder %v1265_v25, 7 }
 0x484   : > { %1565 = vmatprep.subr.mxu0 %v990_v36  ;;  %v977_v50 = vld [vmem:[%s2208_s6] sm:$0xff]  ;;  %v1397_v54 = vld [vmem:[#allocation11] ss:$0 sm:$0xff] }
 0x485   : > { %v975_v38 = vld [vmem:[#allocation4] sm:$0xff]  ;;  %1566 = vmatpush3.msra.mxu0 %v990_v36  ;;  %v976_v51 = vld [vmem:[#allocation4 + $0x8] sm:$0xff]  ;;  %v1102_v12 = vld [vmem:[%s2211_s9] sm:$0xf] }
 0x486   : > { %1593 = vmatprep.mubr.f32.mxu0 %v975_v38  ;;  %1567 = vmatprep.subr.mxu0 %v989_v37  ;;  %v1103_v15 = vunpack.c.l.bf16 %v1102_v12  ;;  %v1400_v27 = vld [vmem:[%s2210_s8] ss:$0 sm:$0xff] }
 0x487   : > { %1568 = vmatpush3.msra.mxu0 %v989_v37 }
 0x488   : > { %1569 = vmatprep.subr.mxu0 %v988_v39 }
 0x489   : > { %1570 = vmatpush3.msra.mxu0 %v988_v39 }
 0x48a   : > { %1571 = vmatprep.subr.mxu0 %v987_v40 }
 0x48b   : > { %1572 = vmatpush3.msra.mxu0 %v987_v40 }
 0x48c   : > { %1573 = vmatprep.subr.mxu0 %v986_v41 }
 0x48d   : > { %1574 = vmatpush3.msra.mxu0 %v986_v41 }
 0x48e   : > { %1575 = vmatprep.subr.mxu0 %v985_v42 }
 0x48f   : > { %1576 = vmatpush3.msra.mxu0 %v985_v42 }
 0x490   : > { %1577 = vmatprep.subr.mxu0 %v984_v43 }
 0x491   : > { %1578 = vmatpush3.msra.mxu0 %v984_v43 }
 0x492   : > { %1579 = vmatprep.subr.mxu0 %v983_v44 }
 0x493   : > { %1580 = vmatpush3.msra.mxu0 %v983_v44 }
 0x494   : > { %1581 = vmatprep.subr.mxu0 %v982_v45 }
 0x495   : > { %1582 = vmatpush3.msra.mxu0 %v982_v45 }
 0x496   : > { %1583 = vmatprep.subr.mxu0 %v981_v46 }
 0x497   : > { %1584 = vmatpush3.msra.mxu0 %v981_v46 }
 0x498   : > { %1585 = vmatprep.subr.mxu0 %v980_v47 }
 0x499   : > { %1586 = vmatpush3.msra.mxu0 %v980_v47 }
 0x49a   : > { %1587 = vmatprep.subr.mxu0 %v979_v48 }
 0x49b   : > { %1588 = vmatpush3.msra.mxu0 %v979_v48 }
 0x49c   : > { %1589 = vmatprep.subr.mxu0 %v978_v49 }
 0x49d   : > { %1590 = vmatpush3.msra.mxu0 %v978_v49 }
 0x49e   : > { %1591 = vmatprep.subr.mxu0 %v977_v50 }
 0x49f   : > { %1592 = vmatpush3.msra.mxu0 %v977_v50 }
 0x4a0   : > { %1594 = vmatmul.mubr.f32.vlgmr.msra.gmra.mxu0 %v976_v51 }
 0x560   : > { %v1595_v52 = vpop.f32.mrf.mxu0 }
 0x561   : > { %v1076_v56 = vmul.f32 %v1595_v52, %v1397_v54 }
 0x562   : > { %v1059_v53 = vpop.f32.mrf.mxu0 }
 0x563   : > { %v1075_v55 = vmul.f32 %v1397_v54, %v1059_v53 }
 0x565   : > { %1077 = vadd.xlane.f32.xlu0 %v1075_v55 }
 0x569   : > { %1079 = vadd.xlane.f32.xlu0 %v1076_v56 }
 0x5ee   : > { %v1078_v58 = vpop.xlane.xlu0 %1077 }
 0x5ef   : > { %v1083_v59 = vmul.f32 0.2, %v1078_v58  ;;  %vm1081_vm11 = vcmp.gt.f32.partialorder %v1078_v58, 0.0 }
 0x5f1   : > { %v1085_v62 = vsel %vm1081_vm11, %v1078_v58, %v1083_v59 }
 0x5f2   : > { %v1080_v60 = vpop.xlane.xlu0 %1079 }
 0x5f3   : > { %vm1082_vm12 = vcmp.gt.f32.partialorder %v1080_v60, 0.0  ;;  %v1084_v61 = vmul.f32 0.2, %v1080_v60 }
 0x5f5   : > { %v1086_v63 = vsel %vm1082_vm12, %v1080_v60, %v1084_v61 }
 0x5f6   : > { %v1087_v0 = vmax.f32 %v1085_v62, %v1086_v63 }
 0x5f8   : > { %v1088_v2 = vrot.slane %v1087_v0, 4 }
 0x5fa   : > { %v1089_v3 = vmax.f32 %v1087_v0, %v1088_v2 }
 0x5fc   : > { %v1090_v4 = vrot.slane %v1089_v3, 2 }
 0x5fe   : > { %v1091_v5 = vmax.f32 %v1089_v3, %v1090_v4 }
 0x600   : > { %v1092_v6 = vrot.slane %v1091_v5, 1 }
 0x602   : > { %v1093_v7 = vmax.f32 %v1091_v5, %v1092_v6 }
 0x604   : > { %v1094_v8 = vsub.f32 %v1085_v62, %v1093_v7  ;;  %v1095_v9 = vsub.f32 %v1086_v63, %v1093_v7 }
 0x606   : > { %v1096_v10 = vmul.f32 1.442695, %v1094_v8  ;;  %v1098_v1 = vmul.f32 1.442695, %v1095_v9 }
 0x608   : > { %1687 = vpow2.f32 %v1096_v10 }
 0x609   : > { %1689 = vpow2.f32 %v1098_v1 }
 0x615   : > { %v1688_v11 = vpop.eup %1687 }
 0x616   : > { %v1690_v13 = vpop.eup %1689  ;;  %v1100_v16 = vmul.f32 %v1688_v11, %v1059_v53 }
 0x617   : > { %v1101_v14 = vmul.f32 %v1690_v13, %v1595_v52 }
 0x619   : > { %1597 = vmatpush3.msra.mxu1 %v1101_v14 }
 0x61a   : > { %1598 = vmatprep.subr.mxu1 %v1859_v57 }
 0x61b   : > { %1599 = vmatpush3.msra.mxu1 %v1100_v16 }
 0x61c   : > { %1601 = vmatmul.mubr.msk.f32.vlgmr.msra.gmra.mxu1 %vm1104_vm13, %v1103_v15  ;;  %1603 = vmatprep.subr.mxu1 %v1859_v57 }
 0x61d   : > { %1604 = vmatpush3.msra.mxu1 %v1690_v13  ;;  %1607 = vmatprep.mubr.msk.f32.mxu1 %vm1860_vm10, %v1859_v57 }
 0x61e   : > { %1605 = vmatprep.subr.mxu1 %v1859_v57 }
 0x61f   : > { %1606 = vmatpush3.msra.mxu1 %v1688_v11 }
 0x620   : > { %1608 = vmatmul.mubr.msk.f32.vlgmr.msra.gmra.mxu1 %vm1104_vm13, %v1103_v15 }
 0x6dc   : > { %v1174_v18 = vpop.f32.mrf.mxu1 }
 0x6de   : > { %v1602_v19 = vpop.f32.mrf.mxu1 }
 0x6e0   : > { %v1244_v20 = vpop.f32.mrf.mxu1 }
 0x6e1   : > { %v1248_v21 = vmax.f32 %v1244_v20, 1e-30 }
 0x6e2   : > { %v1609_v22 = vpop.f32.mrf.mxu1 }
 0x6e3   : > { %1691 = vrcp.f32 %v1248_v21 }
 0x6f0   : > { %v1692_v23 = vpop.eup %1691 }
 0x6f1   : > { %1252 = vperm.xlu1 %1685, %v1692_v23  }
 0x76c   : > { %v1253_v26 = vpop.permute.xlu1 %1252 }
 0x76d   : > { %v1255_v28 = vmul.f32 %v1253_v26, %v1174_v18 }
 0x76f   : > { %v1263_v29 = vadd.f32 %v1400_v27, %v1255_v28 }
 0x771   : > { %v1267_v30 = vsel %vm1266_vm14, %v1263_v29, -1e+30 }
 0x772   : > { %1268 = vmax.xlane.f32.xlu1 %v1267_v30 }
 0x7fb   : > { %v1269_v31 = vpop.xlane.xlu1 %1268 }
 0x7fc   : > { %v1270_v32 = vsub.f32 %v1263_v29, %v1269_v31 }
 0x7fe   : > { %v1271_v33 = vsel %vm1266_vm14, %v1270_v32, -1e+30 }
 0x7ff   : > { %v1272_v34 = vmul.f32 1.442695, %v1271_v33 }
 0x801   : > { %1693 = vpow2.f32 %v1272_v34 }
 0x80e   : > { %v1694_v35 = vpop.eup %1693 }
 0x80f   : > { %1274 = vadd.xlane.f32.xlu0 %v1694_v35 }
 0x898   : > { %v1275_v36 = vpop.xlane.xlu0 %1274 }
 0x899   : > { %1695 = vlog2.f32 %v1275_v36 }
 0x8a6   : > { %v1696_v37 = vpop.eup %1695 }
 0x8a7   : > { %v1277_v38 = vmul.f32 0.6931472, %v1696_v37 }
 0x8a9   : > { %v1278_v39 = vsub.f32 %v1270_v32, %v1277_v38 }
 0x8ab   : > { %v1279_v40 = vsel %vm1266_vm14, %v1278_v39, 0.0 }
 0x8ac   : > { %1280 = vst [vmem:[#allocation13] sm:$0xff] %v1279_v40 }
 0x8ad PF: > { %p1651_p3 = scmp.eq.s32.totalorder %s1924_s14, 1  ;;  %s1862_s11 = smov [#allocation13]  }
 0x8ae   : > { %s1288_s12 = sshll.u32 %s1862_s11, 4  ;;  %s1289_s12 = int_to_ptr.vmem [resolvable:$true] %s1288_s12 }
 0x8af   : > { %s1801_s16 = scalar_lea.vmem %s1289_s12, 128  ;;  %p1808_p10 = scmp.lt.s32.totalorder %s1289_s12, %s1289_s12 }
 0x8b0   : > { %p1802_p6 = scmp.ne.s32.totalorder %s1289_s12, %s1801_s16  ;;  %p1809_p11 = scmp.lt.s32.totalorder %s1801_s16, %s1801_s16 }
 0x8b2   : > { %p1803_p7 = pnand %p1802_p6, %p1651_p3  ;;  %p1810_p12 = por %p1809_p11, %p1808_p10 }
 0x8b4   : > { %p1804_p9 = pneg %p1803_p7 }
 0x8b6   : > { %p1811_p13 = pnand %p1810_p12, %p1804_p9 }
 0x8b8   : > { %1814 = shalt.err (!%p1811_p13)
}
 0x8b9   : > { %1627 = dma.vmem_to_hbm [thread:$0]  (%p1651_p3), %s1289_s12, 128, %s2212_s10, [#allocation7]  }
 0x8ba   : > { %1842 = dma.done.wait (%p1651_p3), [#allocation7], 128  }
 0x8bb   : > { %1844 = vsyncadd (%p1651_p3), [#allocation7], 4294967168 }
 0x8bc PF: > { %s24_s13 = sadd.s32 1, %s1847_s13  }
 0x8bd   : > { %p21_p0 = scmp.ge.s32.totalorder %s24_s13, 4  }
 0x8bf   :  { %23 = sbr.rel (!%p21_p0) target bundleno = 4 (0x4), region = 113 }
 0x8c4   :  { %1301 = vsyncpa [#allocation6], 1 }
 0x8c5   :  { %1303 = vsyncpa [#allocation6 + $0x1], 1 }
 0x8c6   :  { %1304 = vsyncpa [#allocation9], 1 }
 0x8c7   :  { %1305 = vsyncpa [#allocation12], 1 }
 0x8c8   :  { %1306 = vsyncpa [#allocation7], 1 }
 0x8c9   :  { %1308 = vsyncpa [#allocation7 + $0x1], 1 }

</bundles_post_ra>
